<compile_context>
chip_gen: v7x
topology: tpu7x:2x2x1
jax: 0.10.0
libtpu: 0.0.40
codegen_flags: <defaults>
</compile_context>

<pallas_src>
import jax
import jax.numpy as jnp
from jax.experimental import pallas as pl
from jax.experimental.pallas import tpu as pltpu


def _round_up(x: int, m: int) -> int:
    return (x + m - 1) // m * m


def actor_kernel(x_ref, w1_ref, b1_ref, w2_ref, b2_ref, w3_ref, b3_ref,
                 probs_ref):
    """Fused MLP + softmax for one batch tile.

    x_ref:              (TB, S)      bf16
    w{1,2,3}_ref:       (in, out)    bf16 (w3 lane-padded to 128-multiple)
    b{1,2}_ref:         (1, H)       f32
    b3_ref:             (1, A_pad)   f32 (-1e30 in padded columns)
    probs_ref:          (TB, A_pad)  f32
    """
    x = x_ref[...]                                   # bf16

    # Hidden layer 1: Linear (bf16 MXU, f32 accumulate) + bias + ReLU in f32.
    h = jnp.dot(x, w1_ref[...], preferred_element_type=jnp.float32)
    h = jnp.maximum(h + b1_ref[...], 0.0)

    # Hidden layer 2.
    h = jnp.dot(h.astype(jnp.bfloat16), w2_ref[...],
                preferred_element_type=jnp.float32)
    h = jnp.maximum(h + b2_ref[...], 0.0)

    # Output layer (lane-padded); padded columns get bias -1e30 -> prob 0.
    logits = jnp.dot(h.astype(jnp.bfloat16), w3_ref[...],
                     preferred_element_type=jnp.float32)
    logits = logits + b3_ref[...]

    # Numerically stable softmax over the padded last dim.
    m = jnp.max(logits, axis=-1, keepdims=True)
    e = jnp.exp(logits - m)
    denom = jnp.sum(e, axis=-1, keepdims=True)
    probs_ref[...] = (e * pl.reciprocal(denom, approx=True)).astype(
        probs_ref.dtype)


def actor_forward(state, params, *, tb_max: int = 256):
    """Run the fused Actor forward pass; returns action probabilities (B, A)."""
    w1, b1, w2, b2, w3, b3 = params
    B, S = state.shape
    A = w3.shape[1]

    # ---- layout plumbing (wrapper-side, outside the kernel) ----------------
    # Lane-dense output: pad action dim to a multiple of 128.
    A_pad = _round_up(max(A, 128), 128)
    w3p = jnp.zeros((w3.shape[0], A_pad), w3.dtype).at[:, :A].set(w3)
    b3p = jnp.full((1, A_pad), -1e30, jnp.float32).at[:, :A].set(
        b3.astype(jnp.float32))

    # bf16 MXU inputs: cast state + weights once (halves HBM->VMEM bytes).
    state_bf = state.astype(jnp.bfloat16)
    w1b = w1.astype(jnp.bfloat16)
    w2b = w2.astype(jnp.bfloat16)
    w3b = w3p.astype(jnp.bfloat16)
    b1f = b1.astype(jnp.float32)
    b2f = b2.astype(jnp.float32)

    # Batch tile: multiple of 16 (bf16 sublane packing), capped at 256 so
    # activations stay well inside the vreg file.
    TB = min(tb_max, _round_up(B, 16))
    B_pad = _round_up(B, TB)
    if B_pad != B:
        state_bf = jnp.pad(state_bf, ((0, B_pad - B), (0, 0)))
    grid = (B_pad // TB,)

    def resident(shape):
        # Weight/bias blocks: same block every grid step -> stay VMEM-resident.
        return pl.BlockSpec(shape, lambda i: tuple(0 for _ in shape))

    probs_pad = pl.pallas_call(
        actor_kernel,
        out_shape=jax.ShapeDtypeStruct((B_pad, A_pad), jnp.float32),
        grid=grid,
        in_specs=[
            pl.BlockSpec((TB, S), lambda i: (i, 0)),      # state: batch-tiled
            resident(w1b.shape), resident(b1f.shape),
            resident(w2b.shape), resident(b2f.shape),
            resident(w3b.shape), resident(b3p.shape),
        ],
        out_specs=pl.BlockSpec((TB, A_pad), lambda i: (i, 0)),
        compiler_params=pltpu.CompilerParams(
            dimension_semantics=("parallel",)),
    )(state_bf, w1b, b1f, w2b, b2f, w3b, b3p)

    return probs_pad[:B, :A]


def init_params(key, state_dim, hidden_dims, action_dim):
    """Deterministic synthetic parameter init (Kaiming-ish uniform)."""
    dims = [state_dim] + list(hidden_dims) + [action_dim]
    params = []
    for i in range(len(dims) - 1):
        key, kw, kb = jax.random.split(key, 3)
        fan_in = dims[i]
        bound = 1.0 / (fan_in ** 0.5)
        w = jax.random.uniform(kw, (dims[i], dims[i + 1]), jnp.float32,
                               -bound, bound)
        b = jax.random.uniform(kb, (1, dims[i + 1]), jnp.float32,
                               -bound, bound)
        params += [w, b]
    return tuple(params)


def actor_forward_ref(state, params):
    """Pure-JAX f32 reference for correctness checking."""
    w1, b1, w2, b2, w3, b3 = params
    h = jnp.maximum(state @ w1 + b1, 0.0)
    h = jnp.maximum(h @ w2 + b2, 0.0)
    logits = h @ w3 + b3
    return jax.nn.softmax(logits, axis=-1)


if __name__ == "__main__":
    # Small shapes consistent with the module's MLP forward.
    batch = 8
    state_dim = 32
    hidden_dims = [64, 64]   # stands in for _cfg.agent.actor_hidden_dims
    action_dim = 16

    key = jax.random.PRNGKey(0)
    key, ks = jax.random.split(key)
    state = jax.random.normal(ks, (batch, state_dim), jnp.float32)
    params = init_params(key, state_dim, hidden_dims, action_dim)

    probs = actor_forward(state, params)
    probs = jax.block_until_ready(probs)

    # Sanity check against the pure-JAX f32 reference (Categorical's probs
    # tensor).  Tolerances account for bf16 MXU inputs + EUP approx reciprocal.
    ref = actor_forward_ref(state, params)
    assert probs.shape == (batch, action_dim)
    assert jnp.allclose(probs, ref, atol=2e-2, rtol=2e-2)
    assert jnp.allclose(jnp.sum(probs, axis=-1), 1.0, atol=5e-3)

    # TODO(synk): Categorical sampling/log_prob/entropy are distribution-object
    # utilities, not part of the tensor forward pass; consume `probs` in JAX
    # (e.g. jax.random.categorical on log(probs)) if sampling is needed.
    print("KERNEL_OK")
</pallas_src>

<mosaic_0001>
module attributes {stable_mosaic.version = 11 : i64} {
  func.func @actor_kernel(%arg0: i32, %arg1: memref<16x32xbf16, #tpu.memory_space<vmem>>, %arg2: memref<32x64xbf16, #tpu.memory_space<vmem>>, %arg3: memref<1x64xf32, #tpu.memory_space<vmem>>, %arg4: memref<64x64xbf16, #tpu.memory_space<vmem>>, %arg5: memref<1x64xf32, #tpu.memory_space<vmem>>, %arg6: memref<64x128xbf16, #tpu.memory_space<vmem>>, %arg7: memref<1x128xf32, #tpu.memory_space<vmem>>, %arg8: memref<16x128xf32, #tpu.memory_space<vmem>>) attributes {dimension_semantics = [#tpu.dimension_semantics<parallel>], iteration_bounds = array<i64: 1>, scalar_prefetch = 0 : i64, scratch_operands = 0 : i64, tpu.core_type = #tpu.core_type<tc>, window_params = [{transform_indices = @transform_0, window_bounds = array<i64: 16, 32>}, {pipeline_mode = #tpu.pipeline_mode<synchronous>, transform_indices = @transform_1, window_bounds = array<i64: 32, 64>}, {pipeline_mode = #tpu.pipeline_mode<synchronous>, transform_indices = @transform_2, window_bounds = array<i64: 1, 64>}, {pipeline_mode = #tpu.pipeline_mode<synchronous>, transform_indices = @transform_3, window_bounds = array<i64: 64, 64>}, {pipeline_mode = #tpu.pipeline_mode<synchronous>, transform_indices = @transform_4, window_bounds = array<i64: 1, 64>}, {pipeline_mode = #tpu.pipeline_mode<synchronous>, transform_indices = @transform_5, window_bounds = array<i64: 64, 128>}, {pipeline_mode = #tpu.pipeline_mode<synchronous>, transform_indices = @transform_6, window_bounds = array<i64: 1, 128>}, {transform_indices = @transform_7, window_bounds = array<i64: 16, 128>}]} {
    %c0 = arith.constant 0 : index
    %c0_0 = arith.constant 0 : index
    %0 = vector.load %arg1[%c0, %c0_0] : memref<16x32xbf16, #tpu.memory_space<vmem>>, vector<16x32xbf16>
    %c0_1 = arith.constant 0 : index
    %c0_2 = arith.constant 0 : index
    %1 = vector.load %arg2[%c0_1, %c0_2] : memref<32x64xbf16, #tpu.memory_space<vmem>>, vector<32x64xbf16>
    %cst = arith.constant dense<0.000000e+00> : vector<16x64xf32>
    %2 = tpu.matmul %0, %1, %cst {dimension_numbers = #tpu.dot_dimension_numbers<[1], [0], [0], [1], [0, 0, 1, 1], [], []>} : vector<16x32xbf16>, vector<32x64xbf16>, vector<16x64xf32> -> vector<16x64xf32>
    %c0_3 = arith.constant 0 : index
    %c0_4 = arith.constant 0 : index
    %3 = vector.load %arg3[%c0_3, %c0_4] : memref<1x64xf32, #tpu.memory_space<vmem>>, vector<1x64xf32>
    %4 = vector.broadcast %3 : vector<1x64xf32> to vector<16x64xf32>
    %5 = arith.addf %2, %4 : vector<16x64xf32>
    %cst_5 = arith.constant 0.000000e+00 : f32
    %6 = vector.broadcast %cst_5 : f32 to vector<16x64xf32>
    %7 = arith.maximumf %5, %6 : vector<16x64xf32>
    %8 = arith.truncf %7 : vector<16x64xf32> to vector<16x64xbf16>
    %c0_6 = arith.constant 0 : index
    %c0_7 = arith.constant 0 : index
    %9 = vector.load %arg4[%c0_6, %c0_7] : memref<64x64xbf16, #tpu.memory_space<vmem>>, vector<64x64xbf16>
    %cst_8 = arith.constant dense<0.000000e+00> : vector<16x64xf32>
    %10 = tpu.matmul %8, %9, %cst_8 {dimension_numbers = #tpu.dot_dimension_numbers<[1], [0], [0], [1], [0, 0, 1, 1], [], []>} : vector<16x64xbf16>, vector<64x64xbf16>, vector<16x64xf32> -> vector<16x64xf32>
    %c0_9 = arith.constant 0 : index
    %c0_10 = arith.constant 0 : index
    %11 = vector.load %arg5[%c0_9, %c0_10] : memref<1x64xf32, #tpu.memory_space<vmem>>, vector<1x64xf32>
    %12 = vector.broadcast %11 : vector<1x64xf32> to vector<16x64xf32>
    %13 = arith.addf %10, %12 : vector<16x64xf32>
    %cst_11 = arith.constant 0.000000e+00 : f32
    %14 = vector.broadcast %cst_11 : f32 to vector<16x64xf32>
    %15 = arith.maximumf %13, %14 : vector<16x64xf32>
    %16 = arith.truncf %15 : vector<16x64xf32> to vector<16x64xbf16>
    %c0_12 = arith.constant 0 : index
    %c0_13 = arith.constant 0 : index
    %17 = vector.load %arg6[%c0_12, %c0_13] : memref<64x128xbf16, #tpu.memory_space<vmem>>, vector<64x128xbf16>
    %cst_14 = arith.constant dense<0.000000e+00> : vector<16x128xf32>
    %18 = tpu.matmul %16, %17, %cst_14 {dimension_numbers = #tpu.dot_dimension_numbers<[1], [0], [0], [1], [0, 0, 1, 1], [], []>} : vector<16x64xbf16>, vector<64x128xbf16>, vector<16x128xf32> -> vector<16x128xf32>
    %c0_15 = arith.constant 0 : index
    %c0_16 = arith.constant 0 : index
    %19 = vector.load %arg7[%c0_15, %c0_16] : memref<1x128xf32, #tpu.memory_space<vmem>>, vector<1x128xf32>
    %20 = vector.broadcast %19 : vector<1x128xf32> to vector<16x128xf32>
    %21 = arith.addf %18, %20 : vector<16x128xf32>
    %cst_17 = arith.constant dense<0xFF800000> : vector<16xf32>
    %22 = vector.multi_reduction <maximumf>, %21, %cst_17 [1] : vector<16x128xf32> to vector<16xf32>
    %23 = vector.shape_cast %22 : vector<16xf32> to vector<16x1xf32>
    %24 = vector.broadcast %23 : vector<16x1xf32> to vector<16x128xf32>
    %25 = arith.subf %21, %24 : vector<16x128xf32>
    %26 = math.exp %25 : vector<16x128xf32>
    %cst_18 = arith.constant dense<0.000000e+00> : vector<16xf32>
    %27 = vector.multi_reduction <add>, %26, %cst_18 [1] : vector<16x128xf32> to vector<16xf32>
    %28 = vector.shape_cast %27 : vector<16xf32> to vector<16x1xf32>
    %29 = tpu.reciprocal %28 {approx = true} : vector<16x1xf32> -> vector<16x1xf32>
    %30 = vector.broadcast %29 : vector<16x1xf32> to vector<16x128xf32>
    %31 = arith.mulf %26, %30 : vector<16x128xf32>
    %c0_19 = arith.constant 0 : index
    %c0_20 = arith.constant 0 : index
    %32 = vector.load %arg8[%c0_19, %c0_20] : memref<16x128xf32, #tpu.memory_space<vmem>>, vector<16x128xf32>
    tpu.vector_store %arg8[%c0_19, %c0_20], %31 {strides = array<i32>} : memref<16x128xf32, #tpu.memory_space<vmem>>, vector<16x128xf32>,
    return
  }
  func.func @transform_0(%arg0: i32) -> (i32, i32) {
    %c0_i32 = arith.constant 0 : i32
    %c0_i32_0 = arith.constant 0 : i32
    return %arg0, %c0_i32 : i32, i32
  }
  func.func @transform_1(%arg0: i32) -> (i32, i32) {
    %c0_i32 = arith.constant 0 : i32
    %c0_i32_0 = arith.constant 0 : i32
    %c0_i32_1 = arith.constant 0 : i32
    return %c0_i32, %c0_i32_0 : i32, i32
  }
  func.func @transform_2(%arg0: i32) -> (i32, i32) {
    %c0_i32 = arith.constant 0 : i32
    %c0_i32_0 = arith.constant 0 : i32
    %c0_i32_1 = arith.constant 0 : i32
    return %c0_i32, %c0_i32_0 : i32, i32
  }
  func.func @transform_3(%arg0: i32) -> (i32, i32) {
    %c0_i32 = arith.constant 0 : i32
    %c0_i32_0 = arith.constant 0 : i32
    %c0_i32_1 = arith.constant 0 : i32
    return %c0_i32, %c0_i32_0 : i32, i32
  }
  func.func @transform_4(%arg0: i32) -> (i32, i32) {
    %c0_i32 = arith.constant 0 : i32
    %c0_i32_0 = arith.constant 0 : i32
    %c0_i32_1 = arith.constant 0 : i32
    return %c0_i32, %c0_i32_0 : i32, i32
  }
  func.func @transform_5(%arg0: i32) -> (i32, i32) {
    %c0_i32 = arith.constant 0 : i32
    %c0_i32_0 = arith.constant 0 : i32
    %c0_i32_1 = arith.constant 0 : i32
    return %c0_i32, %c0_i32_0 : i32, i32
  }
  func.func @transform_6(%arg0: i32) -> (i32, i32) {
    %c0_i32 = arith.constant 0 : i32
    %c0_i32_0 = arith.constant 0 : i32
    %c0_i32_1 = arith.constant 0 : i32
    return %c0_i32, %c0_i32_0 : i32, i32
  }
  func.func @transform_7(%arg0: i32) -> (i32, i32) {
    %c0_i32 = arith.constant 0 : i32
    %c0_i32_0 = arith.constant 0 : i32
    return %arg0, %c0_i32 : i32, i32
  }
}

</mosaic_0001>

<bundles_post_ra>
// kernel: tpu_custom_call.1
= control target key start
LH: loop header
LB: loop body
LE: loop exit
PB: predicated region body
PF: predicated region fallthrough
CT: control target
= control target key end

     0   :  { %12 = vsyncpa [#allocation3], 0  ;;  %s731_s0 = inlined_call_operand.hbm [shape: bf16[16,32], index: 0, kind: input, shape index: {}]   ;;  %s732_s1 = inlined_call_operand.hbm [shape: bf16[32,64], index: 1, kind: input, shape index: {}]   ;;  %s733_s2 = inlined_call_operand.vmem [shape: f32[1,64], index: 2, kind: input, shape index: {}]   ;;  %s734_s3 = inlined_call_operand.hbm [shape: bf16[64,64], index: 3, kind: input, shape index: {}]   ;;  %s735_s4 = inlined_call_operand.vmem [shape: f32[1,64], index: 4, kind: input, shape index: {}]   ;;  %s736_s5 = inlined_call_operand.hbm [shape: bf16[64,128], index: 5, kind: input, shape index: {}]   ;;  %s737_s6 = inlined_call_operand.vmem [shape: f32[1,128], index: 6, kind: input, shape index: {}]   ;;  %s738_s7 = inlined_call_operand.hbm [shape: f32[16,128], index: 7, kind: output, shape index: {}]  }
   0x1   :  { %13 = vsyncpa [#allocation6], 0 }
   0x2   :  { %14 = vsyncpa [#allocation9], 0 }
   0x3   :  { %15 = vsyncpa [#allocation4], 0  ;;  %s580_s24 = smov [#allocation5]   ;;  %s581_s26 = smov [#allocation2]  }
   0x4   :  { %s33_s25 = sshll.u32 %s580_s24, 4  ;;  %s21_s27 = sshll.u32 %s581_s26, 4  ;;  %s34_s25 = int_to_ptr.vmem [resolvable:$true] %s33_s25  ;;  %s631_s27 = int_to_ptr.vmem [resolvable:$true] %s21_s27 }
   0x5   :  { %s462_s30 = scalar_lea.hbm %s732_s1, 256 }
   0x6   :  { %p463_p0 = scmp.ne.s32.totalorder %s732_s1, %s462_s30  ;;  %p466_p1 = scmp.lt.u32.totalorder %s462_s30, %s732_s1 }
   0x8   :  { %p468_p2 = pnand %p466_p1, %p463_p0 }
   0xa   :  { %471 = shalt.err (!%p468_p2)
}
   0xb   :  { %s472_s12 = scalar_lea.vmem %s34_s25, 256  ;;  %p477_p4 = scmp.lt.s32.totalorder %s34_s25, %s34_s25 }
   0xc   :  { %p473_p3 = scmp.ne.s32.totalorder %s34_s25, %s472_s12  ;;  %p478_p5 = scmp.lt.s32.totalorder %s472_s12, %s472_s12 }
   0xe   :  { %p479_p6 = por %p478_p5, %p477_p4 }
  0x10   :  { %p480_p7 = pnand %p479_p6, %p473_p3 }
  0x12   :  { %483 = shalt.err (!%p480_p7)
}
  0x13   :  { %s582_s13 = smov 64   ;;  %s583_s14 = smov 4  }
  0x14   :  { %39 = dma.hbm_to_vmem [thread:$0]  %s732_s1, 256, %s34_s25, [#allocation6], %s582_s13, %s582_s13, %s583_s14  }
  0x15   :  { %s484_s19 = scalar_lea.hbm %s731_s0, 128 }
  0x16   :  { %p485_p8 = scmp.ne.s32.totalorder %s731_s0, %s484_s19  ;;  %p488_p9 = scmp.lt.u32.totalorder %s484_s19, %s731_s0 }
  0x18   :  { %p490_p10 = pnand %p488_p9, %p485_p8 }
  0x1a   :  { %493 = shalt.err (!%p490_p10)
}
  0x1b   :  { %s494_s24 = scalar_lea.vmem %s631_s27, 128  ;;  %p499_p12 = scmp.lt.s32.totalorder %s631_s27, %s631_s27 }
  0x1c   :  { %p495_p11 = scmp.ne.s32.totalorder %s631_s27, %s494_s24  ;;  %p500_p13 = scmp.lt.s32.totalorder %s494_s24, %s494_s24 }
  0x1e   :  { %p501_p0 = por %p500_p13, %p499_p12 }
  0x20   :  { %p502_p1 = pnand %p501_p0, %p495_p11 }
  0x22   :  { %505 = shalt.err (!%p502_p1)
}
  0x23   :  { %27 = dma.hbm_to_vmem [thread:$0]  %s731_s0, 128, %s631_s27, [#allocation3], %s582_s13, %s582_s13, %s583_s14  }
  0x24   :  { %s584_s26 = smov [#allocation7]   ;;  %s585_s29 = smov [#allocation8]  }
  0x25   :  { %s47_s28 = sshll.u32 %s584_s26, 4  ;;  %s61_s30 = sshll.u32 %s585_s29, 4  ;;  %s48_s28 = int_to_ptr.vmem [resolvable:$true] %s47_s28  ;;  %s668_s30 = int_to_ptr.vmem [resolvable:$true] %s61_s30 }
  0x26   :  { %s506_s10 = scalar_lea.hbm %s734_s3, 512 }
  0x27   :  { %p507_p2 = scmp.ne.s32.totalorder %s734_s3, %s506_s10  ;;  %p510_p3 = scmp.lt.u32.totalorder %s506_s10, %s734_s3 }
  0x29   :  { %p512_p4 = pnand %p510_p3, %p507_p2 }
  0x2b   :  { %515 = shalt.err (!%p512_p4)
}
  0x2c   :  { %s516_s0 = scalar_lea.vmem %s48_s28, 512  ;;  %p521_p6 = scmp.lt.s32.totalorder %s48_s28, %s48_s28 }
  0x2d   :  { %p517_p5 = scmp.ne.s32.totalorder %s48_s28, %s516_s0  ;;  %p522_p7 = scmp.lt.s32.totalorder %s516_s0, %s516_s0 }
  0x2f   :  { %p523_p8 = por %p522_p7, %p521_p6 }
  0x31   :  { %p524_p9 = pnand %p523_p8, %p517_p5 }
  0x33   :  { %527 = shalt.err (!%p524_p9)
}
  0x34   :  { %53 = dma.hbm_to_vmem [thread:$0]  %s734_s3, 512, %s48_s28, [#allocation6], %s582_s13, %s582_s13, %s583_s14  }
  0x35   :  { %s528_s20 = scalar_lea.hbm %s736_s5, 512 }
  0x36   :  { %p529_p10 = scmp.ne.s32.totalorder %s736_s5, %s528_s20  ;;  %p532_p11 = scmp.lt.u32.totalorder %s528_s20, %s736_s5 }
  0x38   :  { %p534_p12 = pnand %p532_p11, %p529_p10 }
  0x3a   :  { %537 = shalt.err (!%p534_p12)
}
  0x3b   :  { %s538_s1 = scalar_lea.vmem %s668_s30, 512  ;;  %p543_p0 = scmp.lt.s32.totalorder %s668_s30, %s668_s30 }
  0x3c   :  { %p539_p13 = scmp.ne.s32.totalorder %s668_s30, %s538_s1  ;;  %p544_p1 = scmp.lt.s32.totalorder %s538_s1, %s538_s1 }
  0x3e   :  { %p545_p2 = por %p544_p1, %p543_p0 }
  0x40   :  { %p546_p3 = pnand %p545_p2, %p539_p13 }
  0x42   :  { %549 = shalt.err (!%p546_p3)
}
  0x43   :  { %67 = dma.hbm_to_vmem [thread:$0]  %s736_s5, 512, %s668_s30, [#allocation9], %s582_s13, %s582_s13, %s583_s14  }
  0x44   :  { %572 = dma.done.wait [#allocation3], 128  }
  0x45   :  { %573 = vsyncadd [#allocation3], 4294967168 }
  0x46   :  { %574 = dma.done.wait [#allocation6], 768  }
  0x47   :  { %575 = vsyncadd [#allocation6], 4294966528 }
  0x48   :  { %576 = dma.done.wait [#allocation9], 512  }
  0x49   :  { %577 = vsyncadd [#allocation9], 4294966784  ;;  %v586_v0 = vmov 0.0   ;;  %vm587_vm0 = vmmov 0   ;;  %v443_v1 = vld [vmem:[#allocation5] sm:$0xff]   ;;  %v444_v2 = vld [vmem:[#allocation5 + $0x8] sm:$0xff]  }
  0x4a   :  { %400 = vmatprep.subr.bf16.mxu0 %v586_v0  ;;  %404 = vmatprep.mubr.msk.bf16.mxu0 %vm587_vm0, %v586_v0  ;;  %v446_v3 = vld [vmem:[#allocation7] sm:$0xff]   ;;  %v445_v4 = vld [vmem:[#allocation2] sm:$0xff]   ;;  %vm113_vm1 = vcmask 261120   ;;  %v448_v6 = vld [vmem:[#allocation7 + $0x10] sm:$0xff]   ;;  %vm200_vm2 = vcmask 523264  }
  0x4b   :  { %408 = vmatprep.subr.bf16.mxu1 %v586_v0  ;;  %416 = vmatprep.mubr.msk.bf16.mxu1 %vm587_vm0, %v586_v0  ;;  %v447_v5 = vld [vmem:[#allocation7 + $0x8] sm:$0xff]   ;;  %v449_v7 = vld [vmem:[#allocation7 + $0x18] sm:$0xff]   ;;  %v450_v8 = vld [vmem:[#allocation8] sm:$0xff]  }
  0x4c   :  { %401 = vmatpush3.bf16.msra.mxu0 %v443_v1  ;;  %409 = vmatpush3.bf16.msra.mxu1 %v446_v3  ;;  %v451_v9 = vld [vmem:[#allocation8 + $0x8] sm:$0xff]   ;;  %v452_v20 = vld [vmem:[#allocation8 + $0x10] sm:$0xff]   ;;  %v453_v21 = vld [vmem:[#allocation8 + $0x18] sm:$0xff]  }
  0x4d   :  { %402 = vmatprep.subr.bf16.mxu0 %v586_v0  ;;  %410 = vmatprep.subr.bf16.mxu1 %v586_v0  ;;  %v370_v10 = vld [vmem:[%s733_s2] ss:$0 sm:$0xff] }
  0x4e   :  { %v375_v22 = vld [vmem:[%s735_s4] ss:$0 sm:$0xff]  ;;  %s588_s4 = smov [#allocation10]  }
  0x4f   :  { %v381_v32 = vld [vmem:[%s737_s6] ss:$0 sm:$0xff]  ;;  %s356_s6 = sshll.u32 %s588_s4, 4  ;;  %s357_s6 = int_to_ptr.vmem [resolvable:$true] %s356_s6 }
  0x50   :  { %403 = vmatpush3.bf16.msra.mxu0 %v444_v2  ;;  %411 = vmatpush3.bf16.msra.mxu1 %v447_v5  ;;  %s550_s29 = scalar_lea.vmem %s357_s6, 256  ;;  %p555_p5 = scmp.lt.s32.totalorder %s357_s6, %s357_s6 }
  0x51   :  { %420 = vmatprep.subr.bf16.mxu0 %v586_v0  ;;  %412 = vmatprep.subr.bf16.mxu1 %v586_v0  ;;  %p551_p4 = scmp.ne.s32.totalorder %s357_s6, %s550_s29  ;;  %p556_p6 = scmp.lt.s32.totalorder %s550_s29, %s550_s29 }
  0x53   :  { %405 = vmatmul.mubr.msk.bf16.vlgmr.msra.gmra.mrb[0].mxu0 %vm113_vm1, %v445_v4  ;;  %p557_p7 = por %p556_p6, %p555_p5 }
  0x54   :  { %428 = vmatprep.mubr.msk.bf16.mxu0 %vm587_vm0, %v586_v0  ;;  %413 = vmatpush3.bf16.msra.mxu1 %v448_v6 }
  0x55   :  { %414 = vmatprep.subr.bf16.mxu1 %v586_v0  ;;  %421 = vmatpush3.bf16.msra.mxu0 %v450_v8  ;;  %p558_p8 = pnand %p557_p7, %p551_p4 }
  0x56   :  { %422 = vmatprep.subr.bf16.mxu0 %v586_v0 }
  0x58   :  { %415 = vmatpush3.bf16.msra.mxu1 %v449_v7 }
  0x59   :  { %423 = vmatpush3.bf16.msra.mxu0 %v451_v9 }
  0x5a   :  { %424 = vmatprep.subr.bf16.mxu0 %v586_v0 }
  0x5d   :  { %425 = vmatpush3.bf16.msra.mxu0 %v452_v20 }
  0x5e   :  { %426 = vmatprep.subr.bf16.mxu0 %v586_v0 }
  0x61   :  { %427 = vmatpush3.bf16.msra.mxu0 %v453_v21 }
 0x126   :  { %v151_v11 = vpop.f32.mrb[0].mxu0 }
 0x127   :  { %v152_v12 = vadd.f32 %v370_v10, %v151_v11  ;;  %v406_v13 = vpop.f32.mrb[1].mxu0 }
 0x128   :  { %v154_v14 = vpop.f32.mrb[2].mxu0 }
 0x129   :  { %v155_v15 = vadd.f32 %v370_v10, %v154_v14  ;;  %v407_v16 = vpop.f32.mrb[3].mxu0  ;;  %v158_v17 = vmax.f32 %v152_v12, 0.0 }
 0x12b   :  { %v159_v18 = vmax.f32 %v155_v15, 0.0 }
 0x12d   :  { %v160_v19 = vpack.c.bf16 %v159_v18, %v158_v17 }
 0x12f   :  { %417 = vmatmul.mubr.msk.bf16.vlgmr.msra.gmra.mrb[0].mxu1 %vm200_vm2, %v160_v19 }
 0x202   :  { %v238_v23 = vpop.f32.mrb[0].mxu1 }
 0x203   :  { %v239_v24 = vadd.f32 %v375_v22, %v238_v23  ;;  %v418_v25 = vpop.f32.mrb[1].mxu1 }
 0x204   :  { %v241_v26 = vpop.f32.mrb[2].mxu1 }
 0x205   :  { %v242_v27 = vadd.f32 %v375_v22, %v241_v26  ;;  %v419_v28 = vpop.f32.mrb[3].mxu1  ;;  %v245_v29 = vmax.f32 %v239_v24, 0.0 }
 0x207   :  { %v246_v30 = vmax.f32 %v242_v27, 0.0 }
 0x209   :  { %v247_v31 = vpack.c.bf16 %v246_v30, %v245_v29 }
 0x20b   :  { %429 = vmatmul.mubr.msk.bf16.vlgmr.msra.gmra.mrb[4].mxu0 %vm200_vm2, %v247_v31 }
 0x2de   :  { %v324_v33 = vpop.f32.mrb[4].mxu0 }
 0x2df   :  { %v325_v34 = vadd.f32 %v381_v32, %v324_v33  ;;  %v430_v35 = vpop.f32.mrb[5].mxu0 }
 0x2e0   :  { %v327_v36 = vpop.f32.mrb[6].mxu0 }
 0x2e1   :  { %331 = vmax.xlane.f32.xlu0 %v325_v34  ;;  %v431_v37 = vpop.f32.mrb[7].mxu0  ;;  %v328_v38 = vadd.f32 %v381_v32, %v327_v36 }
 0x2e5   :  { %333 = vmax.xlane.f32.xlu0 %v328_v38 }
 0x36e   :  { %v332_v39 = vpop.xlane.xlu0 %331 }
 0x36f   :  { %v335_v40 = vsub.f32 %v325_v34, %v332_v39 }
 0x371   :  { %v337_v41 = vmul.f32 1.442695, %v335_v40 }
 0x372   :  { %v334_v42 = vpop.xlane.xlu0 %333 }
 0x373   :  { %454 = vpow2.f32 %v337_v41  ;;  %v336_v43 = vsub.f32 %v328_v38, %v334_v42 }
 0x375   :  { %v339_v44 = vmul.f32 1.442695, %v336_v43 }
 0x377   :  { %456 = vpow2.f32 %v339_v44 }
 0x37d   :  { %v455_v45 = vpop.eup %454 }
 0x37e   :  { %341 = vadd.xlane.f32.xlu1 %v455_v45 }
 0x381   :  { %v457_v46 = vpop.eup %456 }
 0x382   :  { %343 = vadd.xlane.f32.xlu1 %v457_v46 }
 0x40b   :  { %v342_v47 = vpop.xlane.xlu1 %341 }
 0x40c   :  { %458 = vrcp.f32 %v342_v47 }
 0x40f   :  { %v344_v48 = vpop.xlane.xlu1 %343 }
 0x410   :  { %460 = vrcp.f32 %v344_v48 }
 0x416   :  { %v459_v49 = vpop.eup %458 }
 0x417   :  { %v347_v50 = vmul.f32 %v459_v49, %v455_v45 }
 0x419   :  { %349 = vst [vmem:[#allocation10] sm:$0xff] %v347_v50 }
 0x41a   :  { %v461_v51 = vpop.eup %460 }
 0x41b   :  { %v348_v52 = vmul.f32 %v461_v51, %v457_v46 }
 0x41d   :  { %350 = vst [vmem:[#allocation10 + $0x8] sm:$0xff] %v348_v52 }
 0x41e   :  { %561 = shalt.err (!%p558_p8)
}
 0x41f   :  { %s562_s9 = scalar_lea.hbm %s738_s7, 256 }
 0x420   :  { %p563_p9 = scmp.ne.s32.totalorder %s738_s7, %s562_s9  ;;  %p566_p10 = scmp.lt.u32.totalorder %s562_s9, %s738_s7 }
 0x422   :  { %p568_p11 = pnand %p566_p10, %p563_p9 }
 0x424   :  { %571 = shalt.err (!%p568_p11)
}
 0x425   :  { %s589_s16 = smov 128   ;;  %s590_s0 = smov 8  }
 0x426   :  { %362 = dma.vmem_to_hbm [thread:$0]  %s357_s6, 256, %s738_s7, [#allocation4], %s589_s16, %s589_s16, %s590_s0  }
 0x427   :  { %578 = dma.done.wait [#allocation4], 256  }
 0x428   :  { %579 = vsyncadd [#allocation4], 4294967040 }
 0x429   :  { %366 = vsyncpa [#allocation3], 1 }
 0x42a   :  { %367 = vsyncpa [#allocation6], 1 }
 0x42b   :  { %368 = vsyncpa [#allocation9], 1 }
 0x42c   :  { %369 = vsyncpa [#allocation4], 1 }

</bundles_post_ra>
